<compile_context>
chip_gen: v5e
topology: v5e:2x2
jax: 0.10.0
libtpu: 0.0.40
codegen_flags: <defaults>
</compile_context>

<pallas_src>
import functools

import jax
import jax.numpy as jnp
from jax.experimental import pallas as pl
from jax.experimental.pallas import tpu as pltpu


# ----------------------------------------------------------------------------- helpers
def _round_up(x, m):
    return ((x + m - 1) // m) * m


def _vmem_capacity_bytes():
    """Per-core VMEM capacity; conservative (v7x) fallback if the query fails."""
    try:
        cap = int(getattr(pltpu.get_tpu_info(), "vmem_capacity_bytes", 0))
        if cap > 0:
            return cap
    except Exception:
        pass
    try:
        kind = jax.devices()[0].device_kind.lower()
        if "v5" in kind or "v6" in kind:
            return 128 * 1024 * 1024
    except Exception:
        pass
    return 64 * 1024 * 1024


def _legal_row_tile(t, n):
    """Row-tile that satisfies the (8,128) rule and never exceeds the array."""
    t = max(1, min(int(t), n))
    if t == n:
        return n                      # full-extent block is always legal
    t = max(8, _round_up(t, 8))
    return n if t >= n else t


def _pick_row_tile(n, default_tn, fits_fn):
    # Cap so the row grid has >= ~8 steps on large N (keeps both v7x TensorCores
    # busy via the "parallel" dimension), but never below 256 rows so per-step
    # overhead stays small on v5e/v6e.
    cap = max(256, _round_up(pl.cdiv(n, 8), 8))
    t = _legal_row_tile(min(int(default_tn), cap), n)
    while t > 8 and not fits_fn(t):
        t = _legal_row_tile(max(8, t // 2), n)
    return t


# ----------------------------------------------------------------------------- kernel math
def _scale_from_sumsq(sumsq, approx_recip):
    """Per-row scale s.t. euclid = x * scale (Poincare log-map rescale)."""
    norm = jnp.sqrt(sumsq)                                    # (tile_n, 1)
    mask = (norm > 1e-10).astype(jnp.float32)
    norm_safe = norm * mask + (1.0 - mask) * 1e-10
    z = jnp.minimum(norm_safe, 0.99)
    # arctanh(z) = 0.5 * log((1+z)/(1-z)); reciprocals go to the EUP slot.
    atanh = 0.5 * jnp.log((1.0 + z) * pl.reciprocal(1.0 - z, approx=approx_recip))
    return atanh * pl.reciprocal(norm_safe, approx=approx_recip) * mask


def _layernorm_relu(y, p_ref, d_true, d_pad):
    """bias add + LayerNorm(eps=1e-5) over the true feature dim + ReLU."""
    bias = p_ref[0:1, :]
    gamma = p_ref[1:2, :]
    beta = p_ref[2:3, :]
    y = y + bias                                              # padded lanes stay exactly 0
    inv_d = 1.0 / float(d_true)
    mean = jnp.sum(y, axis=-1, keepdims=True) * inv_d         # exact: padded y == 0
    diff = y - mean
    if d_true != d_pad:
        diff = diff * p_ref[3:4, :]                           # packed lane mask (no iota/tile)
    var = jnp.sum(diff * diff, axis=-1, keepdims=True) * inv_d
    yn = diff * jax.lax.rsqrt(var + 1e-5) * gamma + beta
    out = jnp.maximum(yn, 0.0)
    if d_true != d_pad:
        out = out[:, :d_true]                                 # output array is unpadded
    return out


def _adapter_kernel_resident(x_ref, wt_ref, p_ref, o_ref, *,
                             d_true, matmul_dtype, approx_recip):
    """Weight-resident path: one row-grid axis, full W^T held in VMEM."""
    x = x_ref[...].astype(jnp.float32)                        # (tile_n, d_pad); pad lanes 0
    scale = _scale_from_sumsq(jnp.sum(x * x, axis=-1, keepdims=True), approx_recip)
    euclid = (x * scale).astype(matmul_dtype)
    y = jnp.dot(euclid, wt_ref[...], preferred_element_type=jnp.float32)
    o_ref[...] = _layernorm_relu(y, p_ref, d_true, y.shape[-1]).astype(o_ref.dtype)


def _adapter_kernel_ktiled(x_ref, wt_ref, p_ref, o_ref, acc_ref, ss_ref, *,
                           d_true, matmul_dtype, approx_recip):
    """Large-D path: W^T streamed over the input-feature (K) grid axis."""
    k = pl.program_id(1)

    @pl.when(k == 0)
    def _():
        acc_ref[...] = jnp.zeros_like(acc_ref)
        ss_ref[...] = jnp.zeros_like(ss_ref)

    xk = x_ref[...].astype(jnp.float32)                       # (tile_n, tile_k)
    ss_ref[...] += jnp.sum(xk * xk, axis=-1, keepdims=True)
    # (x * s) @ W^T == s * (x @ W^T): apply the per-row hyperbolic scale after the
    # K accumulation so the full row norm need not be known before the matmul.
    acc_ref[...] += jnp.dot(xk.astype(matmul_dtype), wt_ref[...],
                            preferred_element_type=jnp.float32)

    @pl.when(k == pl.num_programs(1) - 1)
    def _():
        scale = _scale_from_sumsq(ss_ref[...], approx_recip)
        y = acc_ref[...] * scale
        o_ref[...] = _layernorm_relu(y, p_ref, d_true,
                                     acc_ref.shape[-1]).astype(o_ref.dtype)


# ----------------------------------------------------------------------------- wrapper
def encoder_adapter_hyperbolic(embeddings, weight, bias, gamma, beta, *,
                               matmul_dtype=jnp.bfloat16, out_dtype=None,
                               tile_n=None, tile_k=None, force_k_tiling=False):
    """Pallas TPU forward of EncoderAdapterLayer (use_hyperbolic=True).

    embeddings: (N, D).  weight: (D_out, D_in) = (D, D), PyTorch nn.Linear layout.
    bias / gamma / beta: (D,).  out_dtype defaults to embeddings.dtype (pass
    jnp.bfloat16 to halve output HBM traffic in this memory-bound kernel).
    """
    n, d = embeddings.shape
    if out_dtype is None:
        out_dtype = embeddings.dtype

    strict = jnp.dtype(matmul_dtype) == jnp.dtype(jnp.float32)
    approx_recip = not strict

    # Lane-dense feature dim: pad only when D is not already a multiple of 128.
    d_pad = max(128, _round_up(d, 128))
    need_d_pad = (d_pad != d)

    x_item = jnp.dtype(embeddings.dtype).itemsize
    o_item = jnp.dtype(out_dtype).itemsize
    w_item = jnp.dtype(matmul_dtype).itemsize

    vmem_cap = _vmem_capacity_bytes()
    vmem_budget = int(0.65 * vmem_cap)
    vmem_limit = max(32 * 1024 * 1024, int(0.85 * vmem_cap))

    # ---- host-side (XLA) param packing; x is only padded when D is unaligned ----
    if need_d_pad:
        x_in = jnp.pad(embeddings, ((0, 0), (0, d_pad - d)))
        wt = jnp.pad(weight.T.astype(matmul_dtype),
                     ((0, d_pad - d), (0, d_pad - d)))
    else:
        x_in = embeddings
        wt = weight.T.astype(matmul_dtype)
    params = jnp.zeros((8, d_pad), jnp.float32)
    params = params.at[0, :d].set(bias.astype(jnp.float32))
    params = params.at[1, :d].set(gamma.astype(jnp.float32))
    params = params.at[2, :d].set(beta.astype(jnp.float32))
    if need_d_pad:
        params = params.at[3, :d].set(1.0)        # lane mask for the LN variance

    cost = pl.CostEstimate(
        flops=int(2 * n * d * d + 12 * n * d),
        transcendentals=int(5 * n),
        bytes_accessed=int(n * d * x_item + d * d * w_item + 8 * d_pad * 4
                           + n * d * o_item),
    )

    # Path choice: keep W^T resident unless it would eat most of the VMEM budget.
    wt_resident_bytes = d_pad * d_pad * w_item
    use_k_tiling = bool(force_k_tiling) or (wt_resident_bytes > 0.4 * vmem_budget)

    def _run(build_fn, args):
        # Attempt single-buffered constant blocks (pl.Buffered(1)); fall back to
        # default double-buffering if this jax/Mosaic version rejects it.
        try:
            return build_fn(True)(*args)
        except Exception:
            return build_fn(False)(*args)

    if not use_k_tiling:
        # ---------------------------- weight-resident path ----------------------
        def fits(t):
            return (2 * t * d_pad * x_item          # x tile, double buffered
                    + 2 * t * d * o_item            # out tile, double buffered
                    + wt_resident_bytes             # W^T, single buffered (constant)
                    + 2 * 8 * d_pad * 4             # packed params
                    + 4 * t * d_pad * 4             # f32 temporaries headroom
                    ) <= vmem_budget

        tn = _pick_row_tile(n, 1024 if tile_n is None else tile_n, fits)
        grid = (pl.cdiv(n, tn),)
        kernel = functools.partial(_adapter_kernel_resident, d_true=d,
                                   matmul_dtype=matmul_dtype,
                                   approx_recip=approx_recip)

        def build(single_buffer_consts):
            const_kw = (dict(pipeline_mode=pl.Buffered(1))
                        if single_buffer_consts else {})
            return pl.pallas_call(
                kernel,
                out_shape=jax.ShapeDtypeStruct((n, d), out_dtype),
                grid=grid,
                in_specs=[
                    pl.BlockSpec((tn, d_pad), lambda i: (i, 0)),           # x rows
                    pl.BlockSpec((d_pad, d_pad), lambda i: (0, 0), **const_kw),  # W^T
                    pl.BlockSpec((8, d_pad), lambda i: (0, 0), **const_kw),      # params
                ],
                out_specs=pl.BlockSpec((tn, d), lambda i: (i, 0)),
                compiler_params=pltpu.CompilerParams(
                    dimension_semantics=("parallel",),
                    vmem_limit_bytes=vmem_limit),
                cost_estimate=cost,
            )

        return _run(build, (x_in, wt, params))

    # -------------------------------- K-tiled path ------------------------------
    tk = tile_k
    if tk is None:
        tk = 512
        while d_pad % tk:
            tk -= 128                   # d_pad is a multiple of 128, so this terminates
    tk = int(tk)
    assert d_pad % tk == 0 and tk % 128 == 0, "tile_k must be a 128-multiple divisor of padded D"

    def fits_k(t):
        return (2 * t * tk * x_item                 # x block, double buffered
                + 2 * tk * d_pad * w_item           # W^T block, double buffered
                + 2 * 8 * d_pad * 4                 # packed params
                + 2 * t * d * o_item                # out block (resident across k)
                + t * d_pad * 4                     # f32 accumulator scratch
                + t * 128 * 4                       # row sum-of-squares scratch
                + 3 * t * d_pad * 4                 # f32 temporaries headroom
                ) <= vmem_budget

    tn = _pick_row_tile(n, 256 if tile_n is None else tile_n, fits_k)
    if not fits_k(tn) and tk > 128:
        tk = 128
    # TODO(synk): also tile the output-feature dim for extremely large embed_dim.

    grid = (pl.cdiv(n, tn), d_pad // tk)
    kernel = functools.partial(_adapter_kernel_ktiled, d_true=d,
                               matmul_dtype=matmul_dtype, approx_recip=approx_recip)

    def build(single_buffer_consts):
        const_kw = (dict(pipeline_mode=pl.Buffered(1))
                    if single_buffer_consts else {})
        return pl.pallas_call(
            kernel,
            out_shape=jax.ShapeDtypeStruct((n, d), out_dtype),
            grid=grid,
            in_specs=[
                pl.BlockSpec((tn, tk), lambda i, k: (i, k)),               # x K-slab
                pl.BlockSpec((tk, d_pad), lambda i, k: (k, 0)),            # W^T K-slab
                pl.BlockSpec((8, d_pad), lambda i, k: (0, 0), **const_kw),  # params
            ],
            out_specs=pl.BlockSpec((tn, d), lambda i, k: (i, 0)),
            scratch_shapes=[pltpu.VMEM((tn, d_pad), jnp.float32),   # y accumulator
                            pltpu.VMEM((tn, 1), jnp.float32)],      # row sum of squares
            compiler_params=pltpu.CompilerParams(
                dimension_semantics=("parallel", "arbitrary"),
                vmem_limit_bytes=vmem_limit),
            cost_estimate=cost,
        )

    return _run(build, (x_in, wt, params))


# ----------------------------------------------------------------------------- reference & test
def _reference(x, weight, bias, gamma, beta):
    norm = jnp.linalg.norm(x, axis=-1, keepdims=True)
    mask = (norm > 1e-10).astype(jnp.float32)
    norm = norm * mask + (1.0 - mask) * 1e-10
    factor = jnp.arctanh(jnp.minimum(norm, 0.99)) / norm
    euclid = x * factor * mask
    y = euclid @ weight.T + bias
    mean = jnp.mean(y, axis=-1, keepdims=True)
    var = jnp.mean((y - mean) ** 2, axis=-1, keepdims=True)
    yn = (y - mean) / jnp.sqrt(var + 1e-5) * gamma + beta
    return jnp.maximum(yn, 0.0)


def _make_inputs(key, n, d):
    kx, kw, kb = jax.random.split(key, 3)
    x = 0.3 * jax.random.normal(kx, (n, d), jnp.float32)
    w = 0.1 * jax.random.normal(kw, (d, d), jnp.float32)     # (out, in) nn.Linear layout
    b = 0.05 * jax.random.normal(kb, (d,), jnp.float32)
    g = jnp.ones((d,), jnp.float32)                          # LayerNorm defaults
    be = jnp.zeros((d,), jnp.float32)
    return x, w, b, g, be


if __name__ == "__main__":
    root = jax.random.PRNGKey(0)
    k1, k2, k3 = jax.random.split(root, 3)

    # 1) Module-consistent small shape (embed_dim=32 is not a 128-multiple:
    #    exercises the lane-padded resident path).
    x, w, b, g, be = _make_inputs(k1, 16, 32)
    ref = _reference(x, w, b, g, be)
    out = jax.block_until_ready(
        encoder_adapter_hyperbolic(x, w, b, g, be, matmul_dtype=jnp.float32))
    assert out.shape == (16, 32)
    assert jnp.allclose(out, ref, atol=1e-4, rtol=1e-4), "unaligned-D f32 mismatch"
    out = jax.block_until_ready(encoder_adapter_hyperbolic(x, w, b, g, be))
    assert jnp.allclose(out, ref, atol=3e-2, rtol=3e-2), "unaligned-D bf16 mismatch"

    # 2) 128-aligned embed dim, ragged node count (no pad / no slice path; the
    #    last row tile runs partially out of bounds and is clipped by Pallas).
    x, w, b, g, be = _make_inputs(k2, 136, 128)
    ref = _reference(x, w, b, g, be)
    out = jax.block_until_ready(
        encoder_adapter_hyperbolic(x, w, b, g, be, matmul_dtype=jnp.float32))
    assert out.shape == (136, 128)
    assert jnp.allclose(out, ref, atol=1e-4, rtol=1e-4), "aligned-D f32 mismatch"
    out_bf16 = jax.block_until_ready(
        encoder_adapter_hyperbolic(x, w, b, g, be, out_dtype=jnp.bfloat16))
    assert out_bf16.dtype == jnp.bfloat16
    assert jnp.allclose(out_bf16.astype(jnp.float32), ref, atol=1e-1, rtol=1e-1), \
        "aligned-D bf16-out mismatch"

    # 3) Forced K-tiled path (weight streamed over D_in) at a small shape, to
    #    exercise the large-embed-dim fallback (2 K steps).
    x, w, b, g, be = _make_inputs(k3, 40, 256)
    ref = _reference(x, w, b, g, be)
    out = jax.block_until_ready(
        encoder_adapter_hyperbolic(x, w, b, g, be, matmul_dtype=jnp.float32,
                                   force_k_tiling=True, tile_k=128))
    assert out.shape == (40, 256)
    assert jnp.allclose(out, ref, atol=1e-3, rtol=1e-3), "k-tiled f32 mismatch"

    print("KERNEL_OK")
</pallas_src>

<mosaic_0001>
module attributes {stable_mosaic.version = 11 : i64} {
  func.func @_adapter_kernel_resident(%arg0: i32, %arg1: memref<16x128xf32, #tpu.memory_space<vmem>>, %arg2: memref<128x128xf32, #tpu.memory_space<vmem>>, %arg3: memref<8x128xf32, #tpu.memory_space<vmem>>, %arg4: memref<16x32xf32, #tpu.memory_space<vmem>>) attributes {dimension_semantics = [#tpu.dimension_semantics<parallel>], iteration_bounds = array<i64: 1>, scalar_prefetch = 0 : i64, scratch_operands = 0 : i64, tpu.core_type = #tpu.core_type<tc>, window_params = [{transform_indices = @transform_0, window_bounds = array<i64: 16, 128>}, {pipeline_mode = #tpu.pipeline_mode<synchronous>, transform_indices = @transform_1, window_bounds = array<i64: 128, 128>}, {pipeline_mode = #tpu.pipeline_mode<synchronous>, transform_indices = @transform_2, window_bounds = array<i64: 8, 128>}, {transform_indices = @transform_3, window_bounds = array<i64: 16, 32>}]} {
    %c0 = arith.constant 0 : index
    %c0_0 = arith.constant 0 : index
    %0 = vector.load %arg1[%c0, %c0_0] : memref<16x128xf32, #tpu.memory_space<vmem>>, vector<16x128xf32>
    %1 = arith.mulf %0, %0 : vector<16x128xf32>
    %cst = arith.constant dense<0.000000e+00> : vector<16xf32>
    %2 = vector.multi_reduction <add>, %1, %cst [1] : vector<16x128xf32> to vector<16xf32>
    %3 = vector.shape_cast %2 : vector<16xf32> to vector<16x1xf32>
    %4 = math.sqrt %3 : vector<16x1xf32>
    %cst_1 = arith.constant 1.000000e-10 : f32
    %5 = vector.broadcast %cst_1 : f32 to vector<16x1xf32>
    %6 = arith.cmpf ogt, %4, %5 : vector<16x1xf32>
    %7 = arith.extui %6 : vector<16x1xi1> to vector<16x1xi32>
    %8 = arith.sitofp %7 : vector<16x1xi32> to vector<16x1xf32>
    %9 = arith.mulf %4, %8 : vector<16x1xf32>
    %cst_2 = arith.constant 1.000000e+00 : f32
    %10 = vector.broadcast %cst_2 : f32 to vector<16x1xf32>
    %11 = arith.subf %10, %8 : vector<16x1xf32>
    %cst_3 = arith.constant 1.000000e-10 : f32
    %12 = vector.broadcast %cst_3 : f32 to vector<16x1xf32>
    %13 = arith.mulf %11, %12 : vector<16x1xf32>
    %14 = arith.addf %9, %13 : vector<16x1xf32>
    %cst_4 = arith.constant 9.900000e-01 : f32
    %15 = vector.broadcast %cst_4 : f32 to vector<16x1xf32>
    %16 = arith.minimumf %14, %15 : vector<16x1xf32>
    %cst_5 = arith.constant 1.000000e+00 : f32
    %17 = vector.broadcast %cst_5 : f32 to vector<16x1xf32>
    %18 = arith.addf %17, %16 : vector<16x1xf32>
    %cst_6 = arith.constant 1.000000e+00 : f32
    %19 = vector.broadcast %cst_6 : f32 to vector<16x1xf32>
    %20 = arith.subf %19, %16 : vector<16x1xf32>
    %21 = tpu.reciprocal %20 : vector<16x1xf32> -> vector<16x1xf32>
    %22 = arith.mulf %18, %21 : vector<16x1xf32>
    %23 = math.log %22 : vector<16x1xf32>
    %cst_7 = arith.constant 5.000000e-01 : f32
    %24 = vector.broadcast %cst_7 : f32 to vector<16x1xf32>
    %25 = arith.mulf %24, %23 : vector<16x1xf32>
    %26 = tpu.reciprocal %14 : vector<16x1xf32> -> vector<16x1xf32>
    %27 = arith.mulf %25, %26 : vector<16x1xf32>
    %28 = arith.mulf %27, %8 : vector<16x1xf32>
    %29 = vector.broadcast %28 : vector<16x1xf32> to vector<16x128xf32>
    %30 = arith.mulf %0, %29 : vector<16x128xf32>
    %c0_8 = arith.constant 0 : index
    %c0_9 = arith.constant 0 : index
    %31 = vector.load %arg2[%c0_8, %c0_9] : memref<128x128xf32, #tpu.memory_space<vmem>>, vector<128x128xf32>
    %cst_10 = arith.constant dense<0.000000e+00> : vector<16x128xf32>
    %32 = tpu.matmul %30, %31, %cst_10 {dimension_numbers = #tpu.dot_dimension_numbers<[1], [0], [0], [1], [0, 0, 1, 1], [], []>} : vector<16x128xf32>, vector<128x128xf32>, vector<16x128xf32> -> vector<16x128xf32>
    %c0_11 = arith.constant 0 : index
    %c0_12 = arith.constant 0 : index
    %33 = vector.load %arg3[%c0_11, %c0_12] : memref<8x128xf32, #tpu.memory_space<vmem>>, vector<1x128xf32>
    %c1 = arith.constant 1 : index
    %c0_13 = arith.constant 0 : index
    %34 = vector.load %arg3[%c1, %c0_13] : memref<8x128xf32, #tpu.memory_space<vmem>>, vector<1x128xf32>
    %c2 = arith.constant 2 : index
    %c0_14 = arith.constant 0 : index
    %35 = vector.load %arg3[%c2, %c0_14] : memref<8x128xf32, #tpu.memory_space<vmem>>, vector<1x128xf32>
    %36 = vector.broadcast %33 : vector<1x128xf32> to vector<16x128xf32>
    %37 = arith.addf %32, %36 : vector<16x128xf32>
    %cst_15 = arith.constant dense<0.000000e+00> : vector<16xf32>
    %38 = vector.multi_reduction <add>, %37, %cst_15 [1] : vector<16x128xf32> to vector<16xf32>
    %39 = vector.shape_cast %38 : vector<16xf32> to vector<16x1xf32>
    %cst_16 = arith.constant 3.125000e-02 : f32
    %40 = vector.broadcast %cst_16 : f32 to vector<16x1xf32>
    %41 = arith.mulf %39, %40 : vector<16x1xf32>
    %42 = vector.broadcast %41 : vector<16x1xf32> to vector<16x128xf32>
    %43 = arith.subf %37, %42 : vector<16x128xf32>
    %c3 = arith.constant 3 : index
    %c0_17 = arith.constant 0 : index
    %44 = vector.load %arg3[%c3, %c0_17] : memref<8x128xf32, #tpu.memory_space<vmem>>, vector<1x128xf32>
    %45 = vector.broadcast %44 : vector<1x128xf32> to vector<16x128xf32>
    %46 = arith.mulf %43, %45 : vector<16x128xf32>
    %47 = arith.mulf %46, %46 : vector<16x128xf32>
    %cst_18 = arith.constant dense<0.000000e+00> : vector<16xf32>
    %48 = vector.multi_reduction <add>, %47, %cst_18 [1] : vector<16x128xf32> to vector<16xf32>
    %49 = vector.shape_cast %48 : vector<16xf32> to vector<16x1xf32>
    %cst_19 = arith.constant 3.125000e-02 : f32
    %50 = vector.broadcast %cst_19 : f32 to vector<16x1xf32>
    %51 = arith.mulf %49, %50 : vector<16x1xf32>
    %cst_20 = arith.constant 9.99999974E-6 : f32
    %52 = vector.broadcast %cst_20 : f32 to vector<16x1xf32>
    %53 = arith.addf %51, %52 : vector<16x1xf32>
    %54 = math.rsqrt %53 : vector<16x1xf32>
    %55 = vector.broadcast %54 : vector<16x1xf32> to vector<16x128xf32>
    %56 = arith.mulf %46, %55 : vector<16x128xf32>
    %57 = vector.broadcast %34 : vector<1x128xf32> to vector<16x128xf32>
    %58 = arith.mulf %56, %57 : vector<16x128xf32>
    %59 = vector.broadcast %35 : vector<1x128xf32> to vector<16x128xf32>
    %60 = arith.addf %58, %59 : vector<16x128xf32>
    %cst_21 = arith.constant 0.000000e+00 : f32
    %61 = vector.broadcast %cst_21 : f32 to vector<16x128xf32>
    %62 = arith.maximumf %60, %61 : vector<16x128xf32>
    %63 = vector.extract_strided_slice %62 {offsets = [0, 0], sizes = [16, 32], strides = [1, 1]} : vector<16x128xf32> to vector<16x32xf32>
    %c0_22 = arith.constant 0 : index
    %c0_23 = arith.constant 0 : index
    %64 = vector.load %arg4[%c0_22, %c0_23] : memref<16x32xf32, #tpu.memory_space<vmem>>, vector<16x32xf32>
    tpu.vector_store %arg4[%c0_22, %c0_23], %63 {strides = array<i32>} : memref<16x32xf32, #tpu.memory_space<vmem>>, vector<16x32xf32>,
    return
  }
  func.func @transform_0(%arg0: i32) -> (i32, i32) {
    %c0_i32 = arith.constant 0 : i32
    %c0_i32_0 = arith.constant 0 : i32
    return %arg0, %c0_i32 : i32, i32
  }
  func.func @transform_1(%arg0: i32) -> (i32, i32) {
    %c0_i32 = arith.constant 0 : i32
    %c0_i32_0 = arith.constant 0 : i32
    %c0_i32_1 = arith.constant 0 : i32
    return %c0_i32, %c0_i32_0 : i32, i32
  }
  func.func @transform_2(%arg0: i32) -> (i32, i32) {
    %c0_i32 = arith.constant 0 : i32
    %c0_i32_0 = arith.constant 0 : i32
    %c0_i32_1 = arith.constant 0 : i32
    return %c0_i32, %c0_i32_0 : i32, i32
  }
  func.func @transform_3(%arg0: i32) -> (i32, i32) {
    %c0_i32 = arith.constant 0 : i32
    %c0_i32_0 = arith.constant 0 : i32
    return %arg0, %c0_i32 : i32, i32
  }
}

module attributes {stable_mosaic.version = 11 : i64} {
  func.func @_adapter_kernel_resident(%arg0: i32, %arg1: memref<16x128xf32, #tpu.memory_space<vmem>>, %arg2: memref<128x128xf32, #tpu.memory_space<vmem>>, %arg3: memref<8x128xf32, #tpu.memory_space<vmem>>, %arg4: memref<16x32xf32, #tpu.memory_space<vmem>>) attributes {dimension_semantics = [#tpu.dimension_semantics<parallel>], iteration_bounds = array<i64: 1>, scalar_prefetch = 0 : i64, scratch_operands = 0 : i64, tpu.core_type = #tpu.core_type<tc>, window_params = [{transform_indices = @transform_0, window_bounds = array<i64: 16, 128>}, {pipeline_mode = #tpu.pipeline_mode<synchronous>, transform_indices = @transform_1, window_bounds = array<i64: 128, 128>}, {pipeline_mode = #tpu.pipeline_mode<synchronous>, transform_indices = @transform_2, window_bounds = array<i64: 8, 128>}, {transform_indices = @transform_3, window_bounds = array<i64: 16, 32>}]} {
    %c0 = arith.constant 0 : index
    %c0_0 = arith.constant 0 : index
    %0 = vector.load %arg1[%c0, %c0_0] : memref<16x128xf32, #tpu.memory_space<vmem>>, vector<16x128xf32>
    %1 = arith.mulf %0, %0 : vector<16x128xf32>
    %cst = arith.constant dense<0.000000e+00> : vector<16xf32>
    %2 = vector.multi_reduction <add>, %1, %cst [1] : vector<16x128xf32> to vector<16xf32>
    %3 = vector.shape_cast %2 : vector<16xf32> to vector<16x1xf32>
    %4 = math.sqrt %3 : vector<16x1xf32>
    %cst_1 = arith.constant 1.000000e-10 : f32
    %5 = vector.broadcast %cst_1 : f32 to vector<16x1xf32>
    %6 = arith.cmpf ogt, %4, %5 : vector<16x1xf32>
    %7 = arith.extui %6 : vector<16x1xi1> to vector<16x1xi32>
    %8 = arith.sitofp %7 : vector<16x1xi32> to vector<16x1xf32>
    %9 = arith.mulf %4, %8 : vector<16x1xf32>
    %cst_2 = arith.constant 1.000000e+00 : f32
    %10 = vector.broadcast %cst_2 : f32 to vector<16x1xf32>
    %11 = arith.subf %10, %8 : vector<16x1xf32>
    %cst_3 = arith.constant 1.000000e-10 : f32
    %12 = vector.broadcast %cst_3 : f32 to vector<16x1xf32>
    %13 = arith.mulf %11, %12 : vector<16x1xf32>
    %14 = arith.addf %9, %13 : vector<16x1xf32>
    %cst_4 = arith.constant 9.900000e-01 : f32
    %15 = vector.broadcast %cst_4 : f32 to vector<16x1xf32>
    %16 = arith.minimumf %14, %15 : vector<16x1xf32>
    %cst_5 = arith.constant 1.000000e+00 : f32
    %17 = vector.broadcast %cst_5 : f32 to vector<16x1xf32>
    %18 = arith.addf %17, %16 : vector<16x1xf32>
    %cst_6 = arith.constant 1.000000e+00 : f32
    %19 = vector.broadcast %cst_6 : f32 to vector<16x1xf32>
    %20 = arith.subf %19, %16 : vector<16x1xf32>
    %21 = tpu.reciprocal %20 : vector<16x1xf32> -> vector<16x1xf32>
    %22 = arith.mulf %18, %21 : vector<16x1xf32>
    %23 = math.log %22 : vector<16x1xf32>
    %cst_7 = arith.constant 5.000000e-01 : f32
    %24 = vector.broadcast %cst_7 : f32 to vector<16x1xf32>
    %25 = arith.mulf %24, %23 : vector<16x1xf32>
    %26 = tpu.reciprocal %14 : vector<16x1xf32> -> vector<16x1xf32>
    %27 = arith.mulf %25, %26 : vector<16x1xf32>
    %28 = arith.mulf %27, %8 : vector<16x1xf32>
    %29 = vector.broadcast %28 : vector<16x1xf32> to vector<16x128xf32>
    %30 = arith.mulf %0, %29 : vector<16x128xf32>
    %c0_8 = arith.constant 0 : index
    %c0_9 = arith.constant 0 : index
    %31 = vector.load %arg2[%c0_8, %c0_9] : memref<128x128xf32, #tpu.memory_space<vmem>>, vector<128x128xf32>
    %cst_10 = arith.constant dense<0.000000e+00> : vector<16x128xf32>
    %32 = tpu.matmul %30, %31, %cst_10 {dimension_numbers = #tpu.dot_dimension_numbers<[1], [0], [0], [1], [0, 0, 1, 1], [], []>} : vector<16x128xf32>, vector<128x128xf32>, vector<16x128xf32> -> vector<16x128xf32>
    %c0_11 = arith.constant 0 : index
    %c0_12 = arith.constant 0 : index
    %33 = vector.load %arg3[%c0_11, %c0_12] : memref<8x128xf32, #tpu.memory_space<vmem>>, vector<1x128xf32>
    %c1 = arith.constant 1 : index
    %c0_13 = arith.constant 0 : index
    %34 = vector.load %arg3[%c1, %c0_13] : memref<8x128xf32, #tpu.memory_space<vmem>>, vector<1x128xf32>
    %c2 = arith.constant 2 : index
    %c0_14 = arith.constant 0 : index
    %35 = vector.load %arg3[%c2, %c0_14] : memref<8x128xf32, #tpu.memory_space<vmem>>, vector<1x128xf32>
    %36 = vector.broadcast %33 : vector<1x128xf32> to vector<16x128xf32>
    %37 = arith.addf %32, %36 : vector<16x128xf32>
    %cst_15 = arith.constant dense<0.000000e+00> : vector<16xf32>
    %38 = vector.multi_reduction <add>, %37, %cst_15 [1] : vector<16x128xf32> to vector<16xf32>
    %39 = vector.shape_cast %38 : vector<16xf32> to vector<16x1xf32>
    %cst_16 = arith.constant 3.125000e-02 : f32
    %40 = vector.broadcast %cst_16 : f32 to vector<16x1xf32>
    %41 = arith.mulf %39, %40 : vector<16x1xf32>
    %42 = vector.broadcast %41 : vector<16x1xf32> to vector<16x128xf32>
    %43 = arith.subf %37, %42 : vector<16x128xf32>
    %c3 = arith.constant 3 : index
    %c0_17 = arith.constant 0 : index
    %44 = vector.load %arg3[%c3, %c0_17] : memref<8x128xf32, #tpu.memory_space<vmem>>, vector<1x128xf32>
    %45 = vector.broadcast %44 : vector<1x128xf32> to vector<16x128xf32>
    %46 = arith.mulf %43, %45 : vector<16x128xf32>
    %47 = arith.mulf %46, %46 : vector<16x128xf32>
    %cst_18 = arith.constant dense<0.000000e+00> : vector<16xf32>
    %48 = vector.multi_reduction <add>, %47, %cst_18 [1] : vector<16x128xf32> to vector<16xf32>
    %49 = vector.shape_cast %48 : vector<16xf32> to vector<16x1xf32>
    %cst_19 = arith.constant 3.125000e-02 : f32
    %50 = vector.broadcast %cst_19 : f32 to vector<16x1xf32>
    %51 = arith.mulf %49, %50 : vector<16x1xf32>
    %cst_20 = arith.constant 9.99999974E-6 : f32
    %52 = vector.broadcast %cst_20 : f32 to vector<16x1xf32>
    %53 = arith.addf %51, %52 : vector<16x1xf32>
    %54 = math.rsqrt %53 : vector<16x1xf32>
    %55 = vector.broadcast %54 : vector<16x1xf32> to vector<16x128xf32>
    %56 = arith.mulf %46, %55 : vector<16x128xf32>
    %57 = vector.broadcast %34 : vector<1x128xf32> to vector<16x128xf32>
    %58 = arith.mulf %56, %57 : vector<16x128xf32>
    %59 = vector.broadcast %35 : vector<1x128xf32> to vector<16x128xf32>
    %60 = arith.addf %58, %59 : vector<16x128xf32>
    %cst_21 = arith.constant 0.000000e+00 : f32
    %61 = vector.broadcast %cst_21 : f32 to vector<16x128xf32>
    %62 = arith.maximumf %60, %61 : vector<16x128xf32>
    %63 = vector.extract_strided_slice %62 {offsets = [0, 0], sizes = [16, 32], strides = [1, 1]} : vector<16x128xf32> to vector<16x32xf32>
    %c0_22 = arith.constant 0 : index
    %c0_23 = arith.constant 0 : index
    %64 = vector.load %arg4[%c0_22, %c0_23] : memref<16x32xf32, #tpu.memory_space<vmem>>, vector<16x32xf32>
    tpu.vector_store %arg4[%c0_22, %c0_23], %63 {strides = array<i32>} : memref<16x32xf32, #tpu.memory_space<vmem>>, vector<16x32xf32>,
    return
  }
  func.func @transform_0(%arg0: i32) -> (i32, i32) {
    %c0_i32 = arith.constant 0 : i32
    %c0_i32_0 = arith.constant 0 : i32
    return %arg0, %c0_i32 : i32, i32
  }
  func.func @transform_1(%arg0: i32) -> (i32, i32) {
    %c0_i32 = arith.constant 0 : i32
    %c0_i32_0 = arith.constant 0 : i32
    %c0_i32_1 = arith.constant 0 : i32
    return %c0_i32, %c0_i32_0 : i32, i32
  }
  func.func @transform_2(%arg0: i32) -> (i32, i32) {
    %c0_i32 = arith.constant 0 : i32
    %c0_i32_0 = arith.constant 0 : i32
    %c0_i32_1 = arith.constant 0 : i32
    return %c0_i32, %c0_i32_0 : i32, i32
  }
  func.func @transform_3(%arg0: i32) -> (i32, i32) {
    %c0_i32 = arith.constant 0 : i32
    %c0_i32_0 = arith.constant 0 : i32
    return %arg0, %c0_i32 : i32, i32
  }
}

</mosaic_0001>

<bundles_post_ra>
// kernel: tpu_custom_call.1
= control target key start
LH: loop header
LB: loop body
LE: loop exit
PB: predicated region body
PF: predicated region fallthrough
CT: control target
= control target key end

     0   :  { %8 = vsyncpa [#allocation3], 0  ;;  %s537_s0 = inlined_call_operand.hbm [shape: f32[16,128], index: 0, kind: input, shape index: {}]   ;;  %s538_s1 = inlined_call_operand.hbm [shape: f32[128,128], index: 1, kind: input, shape index: {}]   ;;  %s539_s2 = inlined_call_operand.hbm [shape: f32[8,128], index: 2, kind: input, shape index: {}]   ;;  %s540_s3 = inlined_call_operand.hbm [shape: f32[16,32], index: 3, kind: output, shape index: {}]  }
   0x1   :  { %9 = vsyncpa [#allocation6], 0 }
   0x2   :  { %10 = vsyncpa [#allocation4], 0  ;;  %s28_s14 = sshll.u32 %s538_s1, 4  ;;  %s451_s15 = smov [#allocation5]   ;;  %s29_s14 = int_to_ptr.hbm [resolvable:$true] %s28_s14 }
   0x3   :  { %s30_s16 = sshll.u32 %s451_s15, 4  ;;  %s15_s19 = sshll.u32 %s537_s0, 4  ;;  %s31_s16 = int_to_ptr.vmem [resolvable:$true] %s30_s16  ;;  %s16_s19 = int_to_ptr.hbm [resolvable:$true] %s15_s19 }
   0x4   :  { %s452_s20 = smov 128   ;;  %s453_s21 = smov 8  }
   0x5   :  { %36 = dma.hbm_to_vmem [thread:$0]  %s29_s14, 2048, %s31_s16, [#allocation6], %s452_s20, %s452_s20, %s453_s21  }
   0x6   :  { %s454_s22 = smov [#allocation2]   ;;  %s42_s1 = sshll.u32 %s539_s2, 4  ;;  %s43_s1 = int_to_ptr.hbm [resolvable:$true] %s42_s1 }
   0x7   :  { %s17_s23 = sshll.u32 %s454_s22, 4  ;;  %s455_s0 = smov [#allocation7]   ;;  %s18_s23 = int_to_ptr.vmem [resolvable:$true] %s17_s23 }
   0x8   :  { %23 = dma.hbm_to_vmem [thread:$0]  %s16_s19, 256, %s18_s23, [#allocation3], %s452_s20, %s452_s20, %s453_s21  }
   0x9   :  { %s44_s26 = sshll.u32 %s455_s0, 4  ;;  %s45_s26 = int_to_ptr.vmem [resolvable:$true] %s44_s26 }
   0xa   :  { %47 = dma.hbm_to_vmem [thread:$0]  %s43_s1, 128, %s45_s26, [#allocation6]  }
   0xb   :  { %445 = dma.done.wait [#allocation3], 256  }
   0xc   :  { %446 = vsyncadd [#allocation3], 4294967040 }
   0xd   :  { %447 = dma.done.wait [#allocation6], 2176  }
   0xe   :  { %448 = vsyncadd [#allocation6], 4294965120  ;;  %v493_v0 = vld [vmem:[#allocation2] sm:$0xff]  ;;  %v497_v2 = vld [vmem:[#allocation2 + $0x8] sm:$0xff]  ;;  %v456_v37 = vmov 0.0   ;;  %s457_s2 = smov [#allocation8]  }
   0xf   :  { %v62_v1 = vmul.f32 %v493_v0, %v493_v0  ;;  %v63_v3 = vmul.f32 %v497_v2, %v497_v2  ;;  %v197_v4 = vld [vmem:[#allocation5 + $0x78] sm:$0xff]  ;;  %v196_v5 = vld [vmem:[#allocation5 + $0x70] sm:$0xff]  ;;  %v195_v6 = vld [vmem:[#allocation5 + $0x68] sm:$0xff]  ;;  %s284_s27 = sshll.u32 %s457_s2, 4  ;;  %s286_s30 = sshll.u32 %s540_s3, 4  ;;  %s285_s27 = int_to_ptr.vmem [resolvable:$true] %s284_s27  ;;  %s287_s30 = int_to_ptr.hbm [resolvable:$true] %s286_s30 }
  0x10   :  { %202 = vmatpush.msra.mxu0 %v197_v4  ;;  %302 = vmatpush.msra.mxu1 %v197_v4  ;;  %v194_v7 = vld [vmem:[#allocation5 + $0x60] sm:$0xff]  ;;  %v193_v9 = vld [vmem:[#allocation5 + $0x58] sm:$0xff]  ;;  %v192_v10 = vld [vmem:[#allocation5 + $0x50] sm:$0xff] }
  0x11   :  { %64 = vadd.xlane.f32.xlu0 %v62_v1  ;;  %v191_v11 = vld [vmem:[#allocation5 + $0x48] sm:$0xff]  ;;  %v190_v12 = vld [vmem:[#allocation5 + $0x40] sm:$0xff]  ;;  %v189_v16 = vld [vmem:[#allocation5 + $0x38] sm:$0xff] }
  0x12   :  { %203 = vmatpush.msra.mxu0 %v196_v5  ;;  %303 = vmatpush.msra.mxu1 %v196_v5  ;;  %v188_v18 = vld [vmem:[#allocation5 + $0x30] sm:$0xff]  ;;  %v187_v20 = vld [vmem:[#allocation5 + $0x28] sm:$0xff]  ;;  %v186_v21 = vld [vmem:[#allocation5 + $0x20] sm:$0xff] }
  0x13   :  { %v185_v25 = vld [vmem:[#allocation5 + $0x18] sm:$0xff]  ;;  %v184_v28 = vld [vmem:[#allocation5 + $0x10] sm:$0xff]  ;;  %v183_v32 = vld [vmem:[#allocation5 + $0x8] sm:$0xff] }
  0x14   :  { %204 = vmatpush.msra.mxu0 %v195_v6  ;;  %304 = vmatpush.msra.mxu1 %v195_v6  ;;  %v182_v36 = vld [vmem:[#allocation5] sm:$0xff] }
  0x16   :  { %205 = vmatpush.msra.mxu0 %v194_v7  ;;  %305 = vmatpush.msra.mxu1 %v194_v7 }
  0x18   :  { %206 = vmatpush.msra.mxu0 %v193_v9  ;;  %306 = vmatpush.msra.mxu1 %v193_v9 }
  0x19   :  { %66 = vadd.xlane.f32.xlu0 %v63_v3 }
  0x1a   :  { %207 = vmatpush.msra.mxu0 %v192_v10  ;;  %307 = vmatpush.msra.mxu1 %v192_v10 }
  0x1c   :  { %208 = vmatpush.msra.mxu0 %v191_v11  ;;  %308 = vmatpush.msra.mxu1 %v191_v11 }
  0x1e   :  { %209 = vmatpush.msra.mxu0 %v190_v12  ;;  %309 = vmatpush.msra.mxu1 %v190_v12 }
  0x20   :  { %210 = vmatpush.msra.mxu0 %v189_v16  ;;  %310 = vmatpush.msra.mxu1 %v189_v16 }
  0x22   :  { %211 = vmatpush.msra.mxu0 %v188_v18  ;;  %311 = vmatpush.msra.mxu1 %v188_v18 }
  0x24   :  { %212 = vmatpush.msra.mxu0 %v187_v20  ;;  %312 = vmatpush.msra.mxu1 %v187_v20 }
  0x26   :  { %213 = vmatpush.msra.mxu0 %v186_v21  ;;  %313 = vmatpush.msra.mxu1 %v186_v21 }
  0x28   :  { %214 = vmatpush.msra.mxu0 %v185_v25  ;;  %314 = vmatpush.msra.mxu1 %v185_v25 }
  0x2a   :  { %215 = vmatpush.msra.mxu0 %v184_v28  ;;  %315 = vmatpush.msra.mxu1 %v184_v28 }
  0x2c   :  { %216 = vmatpush.msra.mxu0 %v183_v32  ;;  %316 = vmatpush.msra.mxu1 %v183_v32 }
  0x2e   :  { %217 = vmatpush.msra.mxu0 %v182_v36  ;;  %317 = vmatpush.msra.mxu1 %v182_v36 }
  0x84   :  { %v65_v8 = vpop.xlane.xlu0 %64 }
  0x85   :  { %329 = vrsqrt.f32 %v65_v8  ;;  %vm75_vm0 = vcmp.eq.f32.partialorder %v65_v8, inf  ;;  %v78_v30 = vand.u32 2147483648, %v65_v8  ;;  %vm77_vm1 = vcmp.eq.f32.partialorder %v65_v8, 0.0 }
  0x8b   :  { %v330_v13 = vpop.eup %329 }
  0x8c   :  { %v69_v14 = vmul.f32 %v330_v13, %v65_v8  ;;  %v67_v15 = vpop.xlane.xlu0 %66 }
  0x8d   :  { %331 = vrsqrt.f32 %v67_v15  ;;  %vm87_vm3 = vcmp.eq.f32.partialorder %v67_v15, inf  ;;  %v90_v44 = vand.u32 2147483648, %v67_v15  ;;  %vm89_vm4 = vcmp.eq.f32.partialorder %v67_v15, 0.0 }
  0x8e   :  { %v70_v17 = vmul.f32 %v330_v13, %v69_v14 }
  0x90   :  { %v71_v19 = vmul.f32 0.5, %v70_v17 }
  0x92   :  { %v72_v22 = vsub.f32 1.5, %v71_v19 }
  0x93   :  { %v332_v23 = vpop.eup %331 }
  0x94   :  { %v81_v24 = vmul.f32 %v332_v23, %v67_v15  ;;  %v73_v26 = vmul.f32 %v330_v13, %v72_v22 }
  0x96   :  { %v82_v27 = vmul.f32 %v332_v23, %v81_v24  ;;  %v74_v29 = vmul.f32 %v73_v26, %v65_v8 }
  0x98   :  { %v83_v31 = vmul.f32 0.5, %v82_v27  ;;  %v76_v33 = vsel %vm75_vm0, %v65_v8, %v74_v29 }
  0x99   :  { %v79_v34 = vsel %vm77_vm1, %v78_v30, %v76_v33 }
  0x9a   :  { %v84_v35 = vsub.f32 1.5, %v83_v31  ;;  %vm92_vm2 = vcmp.gt.f32.partialorder %v79_v34, 1e-10 }
  0x9b   :  { %v501_v38 = vsel %vm92_vm2, 1.0, %v456_v37 }
  0x9c   :  { %v85_v39 = vmul.f32 %v332_v23, %v84_v35  ;;  %v100_v40 = vsub.f32 1.0, %v501_v38  ;;  %v98_v42 = vmul.f32 %v501_v38, %v79_v34 }
  0x9e   :  { %v86_v41 = vmul.f32 %v85_v39, %v67_v15  ;;  %v102_v43 = vmul.f32 1e-10, %v100_v40 }
  0xa0   :  { %v505_v45 = vadd.f32 %v102_v43, %v98_v42  ;;  %v88_v46 = vsel %vm87_vm3, %v67_v15, %v86_v41 }
  0xa1   :  { %v91_v47 = vsel %vm89_vm4, %v90_v44, %v88_v46 }
  0xa2   :  { %v106_v48 = vmin.f32 %v505_v45, 0.99  ;;  %vm93_vm5 = vcmp.gt.f32.partialorder %v91_v47, 1e-10  ;;  %v159_v20 = vand.u32 2147483648, %v505_v45  ;;  %vm153_vm13 = vweird.f32 %v505_v45 }
  0xa3   :  { %v508_v50 = vsel %vm93_vm5, 1.0, %v456_v37  ;;  %v157_v22 = vand.u32 2147483647, %v505_v45 }
  0xa4   :  { %v110_v49 = vsub.f32 1.0, %v106_v48  ;;  %v101_v51 = vsub.f32 1.0, %v508_v50  ;;  %v99_v52 = vmul.f32 %v508_v50, %v91_v47  ;;  %v108_v6 = vadd.f32 1.0, %v106_v48 }
  0xa5   :  { %v160_v31 = vor.u32 1.1754944e-38, %v159_v20  ;;  %vm158_vm1 = vcmp.eq.f32.partialorder %v157_v22, 8.507059e+37  ;;  %v328_v20 = vld [vmem:[#allocation7 + $0x2] ss:$0 sm:$0xff] }
  0xa6   :  { %333 = vrcp.f32 %v110_v49  ;;  %v103_v53 = vmul.f32 1e-10, %v101_v51  ;;  %v123_v61 = vand.u32 2147483648, %v110_v49  ;;  %v121_v1 = vand.u32 2147483647, %v110_v49 }
  0xa7   :  { %335 = vrcp.f32 %v505_v45  ;;  %vm117_vm7 = vweird.f32 %v110_v49 }
  0xa8   :  { %v513_v54 = vadd.f32 %v103_v53, %v99_v52  ;;  %v124_v4 = vor.u32 1.1754944e-38, %v123_v61  ;;  %vm122_vm9 = vcmp.eq.f32.partialorder %v121_v1, 8.507059e+37 }
  0xaa   :  { %v107_v55 = vmin.f32 %v513_v54, 0.99  ;;  %v173_v40 = vand.u32 2147483648, %v513_v54  ;;  %vm167_vm3 = vweird.f32 %v513_v54  ;;  %v171_v42 = vand.u32 2147483647, %v513_v54 }
  0xac   :  { %v334_v56 = vpop.eup %333  ;;  %v111_v59 = vsub.f32 1.0, %v107_v55  ;;  %v109_v26 = vadd.f32 1.0, %v107_v55  ;;  %v174_v46 = vor.u32 1.1754944e-38, %v173_v40  ;;  %vm172_vm5 = vcmp.eq.f32.partialorder %v171_v42, 8.507059e+37 }
  0xad   :  { %v336_v57 = vpop.eup %335  ;;  %v113_v58 = vmul.f32 %v334_v56, %v110_v49  ;;  %vm118_vm6 = vweird.f32 %v334_v56 }
  0xae   :  { %v149_v62 = vmul.f32 %v336_v57, %v505_v45  ;;  %337 = vrcp.f32 %v111_v59  ;;  %vm119_vm8 = vmor %vm117_vm7, %vm118_vm6  ;;  %v137_v15 = vand.u32 2147483648, %v111_v59  ;;  %v135_v18 = vand.u32 2147483647, %v111_v59 }
  0xaf   :  { %v114_v60 = vsub.f32 1.0, %v113_v58  ;;  %339 = vrcp.f32 %v513_v54  ;;  %vm154_vm11 = vweird.f32 %v336_v57  ;;  %vm131_vm12 = vweird.f32 %v111_v59  ;;  %v326_v58 = vld [vmem:[#allocation7 + $0x3] ss:$0 sm:$0xff] }
  0xb0   :  { %v150_v5 = vsub.f32 1.0, %v149_v62  ;;  %v138_v23 = vor.u32 1.1754944e-38, %v137_v15  ;;  %vm155_vm15 = vmor %vm153_vm13, %vm154_vm11  ;;  %vm136_vm0 = vcmp.eq.f32.partialorder %v135_v18, 8.507059e+37 }
  0xb1   :  { %v115_v63 = vmul.f32 %v334_v56, %v114_v60 }
  0xb2   :  { %v151_v13 = vmul.f32 %v336_v57, %v150_v5 }
  0xb3   :  { %v116_v3 = vadd.f32 %v334_v56, %v115_v63 }
  0xb4   :  { %v338_v8 = vpop.eup %337  ;;  %v152_v19 = vadd.f32 %v336_v57, %v151_v13 }
  0xb5   :  { %v120_v7 = vsel %vm119_vm8, %v334_v56, %v116_v3  ;;  %v340_v10 = vpop.eup %339  ;;  %v127_v12 = vmul.f32 %v338_v8, %v111_v59  ;;  %vm132_vm10 = vweird.f32 %v338_v8 }
  0xb6   :  { %v125_v9 = vsel %vm122_vm9, %v124_v4, %v120_v7  ;;  %v163_v16 = vmul.f32 %v340_v10, %v513_v54  ;;  %vm133_vm14 = vmor %vm131_vm12, %vm132_vm10  ;;  %v156_v29 = vsel %vm155_vm15, %v336_v57, %v152_v19  ;;  %vm168_vm2 = vweird.f32 %v340_v10 }
  0xb7   :  { %v140_v11 = vmul.f32 %v125_v9, %v108_v6  ;;  %v128_v14 = vsub.f32 1.0, %v127_v12  ;;  %v161_v35 = vsel %vm158_vm1, %v160_v31, %v156_v29  ;;  %vm169_vm4 = vmor %vm167_vm3, %vm168_vm2  ;;  %vm277_vm10 = vcmask 261120  }
  0xb8   :  { %v164_v24 = vsub.f32 1.0, %v163_v16  ;;  %v327_v16 = vld [vmem:[#allocation7 + $0x1] ss:$0 sm:$0xff] }
  0xb9   :  { %341 = vlog2.f32 %v140_v11  ;;  %v129_v17 = vmul.f32 %v338_v8, %v128_v14 }
  0xba   :  { %v165_v34 = vmul.f32 %v340_v10, %v164_v24 }
  0xbb   :  { %v130_v21 = vadd.f32 %v338_v8, %v129_v17 }
  0xbc   :  { %v166_v39 = vadd.f32 %v340_v10, %v165_v34 }
  0xbd   :  { %v134_v27 = vsel %vm133_vm14, %v338_v8, %v130_v21 }
  0xbe   :  { %v139_v30 = vsel %vm136_vm0, %v138_v23, %v134_v27  ;;  %v170_v45 = vsel %vm169_vm4, %v340_v10, %v166_v39 }
  0xbf   :  { %v342_v25 = vpop.eup %341  ;;  %v141_v32 = vmul.f32 %v139_v30, %v109_v26  ;;  %v175_v48 = vsel %vm172_vm5, %v174_v46, %v170_v45 }
  0xc0   :  { %v143_v28 = vmul.f32 0.6931472, %v342_v25 }
  0xc1   :  { %343 = vlog2.f32 %v141_v32 }
  0xc2   :  { %v146_v33 = vmul.f32 0.5, %v143_v28 }
  0xc4   :  { %v176_v36 = vmul.f32 %v161_v35, %v146_v33 }
  0xc6   :  { %v178_v37 = vmul.f32 %v501_v38, %v176_v36 }
  0xc7   :  { %v344_v43 = vpop.eup %343 }
  0xc8   :  { %v180_v41 = vmul.f32 %v178_v37, %v493_v0  ;;  %v145_v44 = vmul.f32 0.6931472, %v344_v43  ;;  %v325_v0 = vld [vmem:[#allocation7] ss:$0 sm:$0xff] }
  0xca   :  { %218 = vmatmul.f32.vlgmr.msra.gmra.mxu0 %v180_v41  ;;  %v147_v47 = vmul.f32 0.5, %v145_v44 }
  0xcc   :  { %v177_v38 = vmul.f32 %v175_v48, %v147_v47 }
  0xce   :  { %v179_v49 = vmul.f32 %v508_v50, %v177_v38 }
  0xd0   :  { %v181_v51 = vmul.f32 %v179_v49, %v497_v2 }
  0xd2   :  { %221 = vmatmul.f32.vlgmr.msra.gmra.mxu1 %v181_v51 }
 0x147   :  { %v219_v52 = vpop.f32.mrf.mxu0 }
 0x148   :  { %v220_v53 = vadd.f32 %v325_v0, %v219_v52 }
 0x14a   :  { %225 = vadd.xlane.f32.xlu1 %v220_v53 }
 0x14f   :  { %v222_v54 = vpop.f32.mrf.mxu1 }
 0x150   :  { %v223_v55 = vadd.f32 %v325_v0, %v222_v54 }
 0x152   :  { %227 = vadd.xlane.f32.xlu1 %v223_v55 }
 0x1bd   :  { %v226_v56 = vpop.xlane.xlu1 %225 }
 0x1be   :  { %v229_v57 = vmul.f32 0.03125, %v226_v56 }
 0x1c0   :  { %v231_v59 = vsub.f32 %v220_v53, %v229_v57 }
 0x1c2   :  { %v235_v60 = vmul.f32 %v326_v58, %v231_v59 }
 0x1c4   :  { %v237_v61 = vmul.f32 %v235_v60, %v235_v60 }
 0x1c5   :  { %v228_v62 = vpop.xlane.xlu1 %227 }
 0x1c6   :  { %239 = vadd.xlane.f32.xlu2 %v237_v61  ;;  %v230_v63 = vmul.f32 0.03125, %v228_v62 }
 0x1c8   :  { %v232_v50 = vsub.f32 %v223_v55, %v230_v63 }
 0x1ca   :  { %v236_v1 = vmul.f32 %v326_v58, %v232_v50 }
 0x1cc   :  { %v238_v2 = vmul.f32 %v236_v1, %v236_v1 }
 0x1ce   :  { %241 = vadd.xlane.f32.xlu2 %v238_v2 }
 0x239   :  { %v240_v3 = vpop.xlane.xlu2 %239 }
 0x23a   :  { %v243_v4 = vmul.f32 0.03125, %v240_v3 }
 0x23c   :  { %v245_v5 = vadd.f32 1e-05, %v243_v4 }
 0x23e   :  { %345 = vrsqrt.f32 %v245_v5  ;;  %vm253_vm7 = vweird.f32 %v245_v5 }
 0x241   :  { %v242_v6 = vpop.xlane.xlu2 %241 }
 0x242   :  { %v244_v8 = vmul.f32 0.03125, %v242_v6 }
 0x244   :  { %v346_v7 = vpop.eup %345  ;;  %v246_v10 = vadd.f32 1e-05, %v244_v8 }
 0x245   :  { %v248_v9 = vmul.f32 %v346_v7, %v245_v5  ;;  %vm254_vm6 = vweird.f32 %v346_v7 }
 0x246   :  { %347 = vrsqrt.f32 %v246_v10  ;;  %vm255_vm8 = vmor %vm253_vm7, %vm254_vm6  ;;  %vm263_vm11 = vweird.f32 %v246_v10 }
 0x247   :  { %v249_v11 = vmul.f32 %v346_v7, %v248_v9 }
 0x249   :  { %v250_v12 = vmul.f32 0.5, %v249_v11 }
 0x24b   :  { %v251_v13 = vsub.f32 1.5, %v250_v12 }
 0x24c   :  { %v348_v15 = vpop.eup %347 }
 0x24d   :  { %v252_v14 = vmul.f32 %v346_v7, %v251_v13  ;;  %v258_v18 = vmul.f32 %v348_v15, %v246_v10  ;;  %vm264_vm9 = vweird.f32 %v348_v15 }
 0x24e   :  { %vm265_vm12 = vmor %vm263_vm11, %vm264_vm9 }
 0x24f   :  { %v256_v17 = vsel %vm255_vm8, %v346_v7, %v252_v14  ;;  %v259_v21 = vmul.f32 %v348_v15, %v258_v18 }
 0x250   :  { %v267_v19 = vmul.f32 %v256_v17, %v235_v60 }
 0x251   :  { %v260_v23 = vmul.f32 0.5, %v259_v21 }
 0x252   :  { %v270_v22 = vmul.f32 %v327_v16, %v267_v19 }
 0x253   :  { %v261_v25 = vsub.f32 1.5, %v260_v23 }
 0x254   :  { %v273_v24 = vadd.f32 %v328_v20, %v270_v22 }
 0x255   :  { %v262_v27 = vmul.f32 %v348_v15, %v261_v25 }
 0x256   :  { %v275_v26 = vmax.f32 %v273_v24, 0.0 }
 0x257   :  { %v266_v28 = vsel %vm265_vm12, %v348_v15, %v262_v27 }
 0x258   :  { %278 = vst.msk [vmem:[#allocation8] sm:$0xff] %vm277_vm10, %v275_v26  ;;  %v268_v29 = vmul.f32 %v266_v28, %v236_v1 }
 0x25a   :  { %v271_v30 = vmul.f32 %v327_v16, %v268_v29 }
 0x25c   :  { %v274_v31 = vadd.f32 %v328_v20, %v271_v30 }
 0x25e   :  { %v276_v32 = vmax.f32 %v274_v31, 0.0 }
 0x260   :  { %279 = vst.msk [vmem:[#allocation8 + $0x8] sm:$0xff] %vm277_vm10, %v276_v32 }
 0x261   :  { %292 = dma.vmem_to_hbm [thread:$0]  %s285_s27, 256, %s287_s30, [#allocation4], %s452_s20, %s452_s20, %s453_s21  }
 0x262   :  { %449 = dma.done.wait [#allocation4], 256  }
 0x263   :  { %450 = vsyncadd [#allocation4], 4294967040 }
 0x264   :  { %297 = vsyncpa [#allocation3], 1 }
 0x265   :  { %298 = vsyncpa [#allocation6], 1 }
 0x266   :  { %299 = vsyncpa [#allocation4], 1 }

// kernel: tpu_custom_call.1
= control target key start
LH: loop header
LB: loop body
LE: loop exit
PB: predicated region body
PF: predicated region fallthrough
CT: control target
= control target key end

     0   :  { %8 = vsyncpa [#allocation3], 0  ;;  %s537_s0 = inlined_call_operand.hbm [shape: f32[16,128], index: 0, kind: input, shape index: {}]   ;;  %s538_s1 = inlined_call_operand.hbm [shape: f32[128,128], index: 1, kind: input, shape index: {}]   ;;  %s539_s2 = inlined_call_operand.hbm [shape: f32[8,128], index: 2, kind: input, shape index: {}]   ;;  %s540_s3 = inlined_call_operand.hbm [shape: f32[16,32], index: 3, kind: output, shape index: {}]  }
   0x1   :  { %9 = vsyncpa [#allocation6], 0 }
   0x2   :  { %10 = vsyncpa [#allocation4], 0  ;;  %s28_s14 = sshll.u32 %s538_s1, 4  ;;  %s451_s15 = smov [#allocation5]   ;;  %s29_s14 = int_to_ptr.hbm [resolvable:$true] %s28_s14 }
   0x3   :  { %s30_s16 = sshll.u32 %s451_s15, 4  ;;  %s15_s19 = sshll.u32 %s537_s0, 4  ;;  %s31_s16 = int_to_ptr.vmem [resolvable:$true] %s30_s16  ;;  %s16_s19 = int_to_ptr.hbm [resolvable:$true] %s15_s19 }
   0x4   :  { %s452_s20 = smov 128   ;;  %s453_s21 = smov 8  }
   0x5   :  { %36 = dma.hbm_to_vmem [thread:$0]  %s29_s14, 2048, %s31_s16, [#allocation6], %s452_s20, %s452_s20, %s453_s21  }
   0x6   :  { %s454_s22 = smov [#allocation2]   ;;  %s42_s1 = sshll.u32 %s539_s2, 4  ;;  %s43_s1 = int_to_ptr.hbm [resolvable:$true] %s42_s1 }
   0x7   :  { %s17_s23 = sshll.u32 %s454_s22, 4  ;;  %s455_s0 = smov [#allocation7]   ;;  %s18_s23 = int_to_ptr.vmem [resolvable:$true] %s17_s23 }
   0x8   :  { %23 = dma.hbm_to_vmem [thread:$0]  %s16_s19, 256, %s18_s23, [#allocation3], %s452_s20, %s452_s20, %s453_s21  }
   0x9   :  { %s44_s26 = sshll.u32 %s455_s0, 4  ;;  %s45_s26 = int_to_ptr.vmem [resolvable:$true] %s44_s26 }
   0xa   :  { %47 = dma.hbm_to_vmem [thread:$0]  %s43_s1, 128, %s45_s26, [#allocation6]  }
   0xb   :  { %445 = dma.done.wait [#allocation3], 256  }
   0xc   :  { %446 = vsyncadd [#allocation3], 4294967040 }
   0xd   :  { %447 = dma.done.wait [#allocation6], 2176  }
   0xe   :  { %448 = vsyncadd [#allocation6], 4294965120  ;;  %v493_v0 = vld [vmem:[#allocation2] sm:$0xff]  ;;  %v497_v2 = vld [vmem:[#allocation2 + $0x8] sm:$0xff]  ;;  %v456_v37 = vmov 0.0   ;;  %s457_s2 = smov [#allocation8]  }
   0xf   :  { %v62_v1 = vmul.f32 %v493_v0, %v493_v0  ;;  %v63_v3 = vmul.f32 %v497_v2, %v497_v2  ;;  %v197_v4 = vld [vmem:[#allocation5 + $0x78] sm:$0xff]  ;;  %v196_v5 = vld [vmem:[#allocation5 + $0x70] sm:$0xff]  ;;  %v195_v6 = vld [vmem:[#allocation5 + $0x68] sm:$0xff]  ;;  %s284_s27 = sshll.u32 %s457_s2, 4  ;;  %s286_s30 = sshll.u32 %s540_s3, 4  ;;  %s285_s27 = int_to_ptr.vmem [resolvable:$true] %s284_s27  ;;  %s287_s30 = int_to_ptr.hbm [resolvable:$true] %s286_s30 }
  0x10   :  { %202 = vmatpush.msra.mxu0 %v197_v4  ;;  %302 = vmatpush.msra.mxu1 %v197_v4  ;;  %v194_v7 = vld [vmem:[#allocation5 + $0x60] sm:$0xff]  ;;  %v193_v9 = vld [vmem:[#allocation5 + $0x58] sm:$0xff]  ;;  %v192_v10 = vld [vmem:[#allocation5 + $0x50] sm:$0xff] }
  0x11   :  { %64 = vadd.xlane.f32.xlu0 %v62_v1  ;;  %v191_v11 = vld [vmem:[#allocation5 + $0x48] sm:$0xff]  ;;  %v190_v12 = vld [vmem:[#allocation5 + $0x40] sm:$0xff]  ;;  %v189_v16 = vld [vmem:[#allocation5 + $0x38] sm:$0xff] }
  0x12   :  { %203 = vmatpush.msra.mxu0 %v196_v5  ;;  %303 = vmatpush.msra.mxu1 %v196_v5  ;;  %v188_v18 = vld [vmem:[#allocation5 + $0x30] sm:$0xff]  ;;  %v187_v20 = vld [vmem:[#allocation5 + $0x28] sm:$0xff]  ;;  %v186_v21 = vld [vmem:[#allocation5 + $0x20] sm:$0xff] }
  0x13   :  { %v185_v25 = vld [vmem:[#allocation5 + $0x18] sm:$0xff]  ;;  %v184_v28 = vld [vmem:[#allocation5 + $0x10] sm:$0xff]  ;;  %v183_v32 = vld [vmem:[#allocation5 + $0x8] sm:$0xff] }
  0x14   :  { %204 = vmatpush.msra.mxu0 %v195_v6  ;;  %304 = vmatpush.msra.mxu1 %v195_v6  ;;  %v182_v36 = vld [vmem:[#allocation5] sm:$0xff] }
  0x16   :  { %205 = vmatpush.msra.mxu0 %v194_v7  ;;  %305 = vmatpush.msra.mxu1 %v194_v7 }
  0x18   :  { %206 = vmatpush.msra.mxu0 %v193_v9  ;;  %306 = vmatpush.msra.mxu1 %v193_v9 }
  0x19   :  { %66 = vadd.xlane.f32.xlu0 %v63_v3 }
  0x1a   :  { %207 = vmatpush.msra.mxu0 %v192_v10  ;;  %307 = vmatpush.msra.mxu1 %v192_v10 }
  0x1c   :  { %208 = vmatpush.msra.mxu0 %v191_v11  ;;  %308 = vmatpush.msra.mxu1 %v191_v11 }
  0x1e   :  { %209 = vmatpush.msra.mxu0 %v190_v12  ;;  %309 = vmatpush.msra.mxu1 %v190_v12 }
  0x20   :  { %210 = vmatpush.msra.mxu0 %v189_v16  ;;  %310 = vmatpush.msra.mxu1 %v189_v16 }
  0x22   :  { %211 = vmatpush.msra.mxu0 %v188_v18  ;;  %311 = vmatpush.msra.mxu1 %v188_v18 }
  0x24   :  { %212 = vmatpush.msra.mxu0 %v187_v20  ;;  %312 = vmatpush.msra.mxu1 %v187_v20 }
  0x26   :  { %213 = vmatpush.msra.mxu0 %v186_v21  ;;  %313 = vmatpush.msra.mxu1 %v186_v21 }
  0x28   :  { %214 = vmatpush.msra.mxu0 %v185_v25  ;;  %314 = vmatpush.msra.mxu1 %v185_v25 }
  0x2a   :  { %215 = vmatpush.msra.mxu0 %v184_v28  ;;  %315 = vmatpush.msra.mxu1 %v184_v28 }
  0x2c   :  { %216 = vmatpush.msra.mxu0 %v183_v32  ;;  %316 = vmatpush.msra.mxu1 %v183_v32 }
  0x2e   :  { %217 = vmatpush.msra.mxu0 %v182_v36  ;;  %317 = vmatpush.msra.mxu1 %v182_v36 }
  0x84   :  { %v65_v8 = vpop.xlane.xlu0 %64 }
  0x85   :  { %329 = vrsqrt.f32 %v65_v8  ;;  %vm75_vm0 = vcmp.eq.f32.partialorder %v65_v8, inf  ;;  %v78_v30 = vand.u32 2147483648, %v65_v8  ;;  %vm77_vm1 = vcmp.eq.f32.partialorder %v65_v8, 0.0 }
  0x8b   :  { %v330_v13 = vpop.eup %329 }
  0x8c   :  { %v69_v14 = vmul.f32 %v330_v13, %v65_v8  ;;  %v67_v15 = vpop.xlane.xlu0 %66 }
  0x8d   :  { %331 = vrsqrt.f32 %v67_v15  ;;  %vm87_vm3 = vcmp.eq.f32.partialorder %v67_v15, inf  ;;  %v90_v44 = vand.u32 2147483648, %v67_v15  ;;  %vm89_vm4 = vcmp.eq.f32.partialorder %v67_v15, 0.0 }
  0x8e   :  { %v70_v17 = vmul.f32 %v330_v13, %v69_v14 }
  0x90   :  { %v71_v19 = vmul.f32 0.5, %v70_v17 }
  0x92   :  { %v72_v22 = vsub.f32 1.5, %v71_v19 }
  0x93   :  { %v332_v23 = vpop.eup %331 }
  0x94   :  { %v81_v24 = vmul.f32 %v332_v23, %v67_v15  ;;  %v73_v26 = vmul.f32 %v330_v13, %v72_v22 }
  0x96   :  { %v82_v27 = vmul.f32 %v332_v23, %v81_v24  ;;  %v74_v29 = vmul.f32 %v73_v26, %v65_v8 }
  0x98   :  { %v83_v31 = vmul.f32 0.5, %v82_v27  ;;  %v76_v33 = vsel %vm75_vm0, %v65_v8, %v74_v29 }
  0x99   :  { %v79_v34 = vsel %vm77_vm1, %v78_v30, %v76_v33 }
  0x9a   :  { %v84_v35 = vsub.f32 1.5, %v83_v31  ;;  %vm92_vm2 = vcmp.gt.f32.partialorder %v79_v34, 1e-10 }
  0x9b   :  { %v501_v38 = vsel %vm92_vm2, 1.0, %v456_v37 }
  0x9c   :  { %v85_v39 = vmul.f32 %v332_v23, %v84_v35  ;;  %v100_v40 = vsub.f32 1.0, %v501_v38  ;;  %v98_v42 = vmul.f32 %v501_v38, %v79_v34 }
  0x9e   :  { %v86_v41 = vmul.f32 %v85_v39, %v67_v15  ;;  %v102_v43 = vmul.f32 1e-10, %v100_v40 }
  0xa0   :  { %v505_v45 = vadd.f32 %v102_v43, %v98_v42  ;;  %v88_v46 = vsel %vm87_vm3, %v67_v15, %v86_v41 }
  0xa1   :  { %v91_v47 = vsel %vm89_vm4, %v90_v44, %v88_v46 }
  0xa2   :  { %v106_v48 = vmin.f32 %v505_v45, 0.99  ;;  %vm93_vm5 = vcmp.gt.f32.partialorder %v91_v47, 1e-10  ;;  %v159_v20 = vand.u32 2147483648, %v505_v45  ;;  %vm153_vm13 = vweird.f32 %v505_v45 }
  0xa3   :  { %v508_v50 = vsel %vm93_vm5, 1.0, %v456_v37  ;;  %v157_v22 = vand.u32 2147483647, %v505_v45 }
  0xa4   :  { %v110_v49 = vsub.f32 1.0, %v106_v48  ;;  %v101_v51 = vsub.f32 1.0, %v508_v50  ;;  %v99_v52 = vmul.f32 %v508_v50, %v91_v47  ;;  %v108_v6 = vadd.f32 1.0, %v106_v48 }
  0xa5   :  { %v160_v31 = vor.u32 1.1754944e-38, %v159_v20  ;;  %vm158_vm1 = vcmp.eq.f32.partialorder %v157_v22, 8.507059e+37  ;;  %v328_v20 = vld [vmem:[#allocation7 + $0x2] ss:$0 sm:$0xff] }
  0xa6   :  { %333 = vrcp.f32 %v110_v49  ;;  %v103_v53 = vmul.f32 1e-10, %v101_v51  ;;  %v123_v61 = vand.u32 2147483648, %v110_v49  ;;  %v121_v1 = vand.u32 2147483647, %v110_v49 }
  0xa7   :  { %335 = vrcp.f32 %v505_v45  ;;  %vm117_vm7 = vweird.f32 %v110_v49 }
  0xa8   :  { %v513_v54 = vadd.f32 %v103_v53, %v99_v52  ;;  %v124_v4 = vor.u32 1.1754944e-38, %v123_v61  ;;  %vm122_vm9 = vcmp.eq.f32.partialorder %v121_v1, 8.507059e+37 }
  0xaa   :  { %v107_v55 = vmin.f32 %v513_v54, 0.99  ;;  %v173_v40 = vand.u32 2147483648, %v513_v54  ;;  %vm167_vm3 = vweird.f32 %v513_v54  ;;  %v171_v42 = vand.u32 2147483647, %v513_v54 }
  0xac   :  { %v334_v56 = vpop.eup %333  ;;  %v111_v59 = vsub.f32 1.0, %v107_v55  ;;  %v109_v26 = vadd.f32 1.0, %v107_v55  ;;  %v174_v46 = vor.u32 1.1754944e-38, %v173_v40  ;;  %vm172_vm5 = vcmp.eq.f32.partialorder %v171_v42, 8.507059e+37 }
  0xad   :  { %v336_v57 = vpop.eup %335  ;;  %v113_v58 = vmul.f32 %v334_v56, %v110_v49  ;;  %vm118_vm6 = vweird.f32 %v334_v56 }
  0xae   :  { %v149_v62 = vmul.f32 %v336_v57, %v505_v45  ;;  %337 = vrcp.f32 %v111_v59  ;;  %vm119_vm8 = vmor %vm117_vm7, %vm118_vm6  ;;  %v137_v15 = vand.u32 2147483648, %v111_v59  ;;  %v135_v18 = vand.u32 2147483647, %v111_v59 }
  0xaf   :  { %v114_v60 = vsub.f32 1.0, %v113_v58  ;;  %339 = vrcp.f32 %v513_v54  ;;  %vm154_vm11 = vweird.f32 %v336_v57  ;;  %vm131_vm12 = vweird.f32 %v111_v59  ;;  %v326_v58 = vld [vmem:[#allocation7 + $0x3] ss:$0 sm:$0xff] }
  0xb0   :  { %v150_v5 = vsub.f32 1.0, %v149_v62  ;;  %v138_v23 = vor.u32 1.1754944e-38, %v137_v15  ;;  %vm155_vm15 = vmor %vm153_vm13, %vm154_vm11  ;;  %vm136_vm0 = vcmp.eq.f32.partialorder %v135_v18, 8.507059e+37 }
  0xb1   :  { %v115_v63 = vmul.f32 %v334_v56, %v114_v60 }
  0xb2   :  { %v151_v13 = vmul.f32 %v336_v57, %v150_v5 }
  0xb3   :  { %v116_v3 = vadd.f32 %v334_v56, %v115_v63 }
  0xb4   :  { %v338_v8 = vpop.eup %337  ;;  %v152_v19 = vadd.f32 %v336_v57, %v151_v13 }
  0xb5   :  { %v120_v7 = vsel %vm119_vm8, %v334_v56, %v116_v3  ;;  %v340_v10 = vpop.eup %339  ;;  %v127_v12 = vmul.f32 %v338_v8, %v111_v59  ;;  %vm132_vm10 = vweird.f32 %v338_v8 }
  0xb6   :  { %v125_v9 = vsel %vm122_vm9, %v124_v4, %v120_v7  ;;  %v163_v16 = vmul.f32 %v340_v10, %v513_v54  ;;  %vm133_vm14 = vmor %vm131_vm12, %vm132_vm10  ;;  %v156_v29 = vsel %vm155_vm15, %v336_v57, %v152_v19  ;;  %vm168_vm2 = vweird.f32 %v340_v10 }
  0xb7   :  { %v140_v11 = vmul.f32 %v125_v9, %v108_v6  ;;  %v128_v14 = vsub.f32 1.0, %v127_v12  ;;  %v161_v35 = vsel %vm158_vm1, %v160_v31, %v156_v29  ;;  %vm169_vm4 = vmor %vm167_vm3, %vm168_vm2  ;;  %vm277_vm10 = vcmask 261120  }
  0xb8   :  { %v164_v24 = vsub.f32 1.0, %v163_v16  ;;  %v327_v16 = vld [vmem:[#allocation7 + $0x1] ss:$0 sm:$0xff] }
  0xb9   :  { %341 = vlog2.f32 %v140_v11  ;;  %v129_v17 = vmul.f32 %v338_v8, %v128_v14 }
  0xba   :  { %v165_v34 = vmul.f32 %v340_v10, %v164_v24 }
  0xbb   :  { %v130_v21 = vadd.f32 %v338_v8, %v129_v17 }
  0xbc   :  { %v166_v39 = vadd.f32 %v340_v10, %v165_v34 }
  0xbd   :  { %v134_v27 = vsel %vm133_vm14, %v338_v8, %v130_v21 }
  0xbe   :  { %v139_v30 = vsel %vm136_vm0, %v138_v23, %v134_v27  ;;  %v170_v45 = vsel %vm169_vm4, %v340_v10, %v166_v39 }
  0xbf   :  { %v342_v25 = vpop.eup %341  ;;  %v141_v32 = vmul.f32 %v139_v30, %v109_v26  ;;  %v175_v48 = vsel %vm172_vm5, %v174_v46, %v170_v45 }
  0xc0   :  { %v143_v28 = vmul.f32 0.6931472, %v342_v25 }
  0xc1   :  { %343 = vlog2.f32 %v141_v32 }
  0xc2   :  { %v146_v33 = vmul.f32 0.5, %v143_v28 }
  0xc4   :  { %v176_v36 = vmul.f32 %v161_v35, %v146_v33 }
  0xc6   :  { %v178_v37 = vmul.f32 %v501_v38, %v176_v36 }
  0xc7   :  { %v344_v43 = vpop.eup %343 }
  0xc8   :  { %v180_v41 = vmul.f32 %v178_v37, %v493_v0  ;;  %v145_v44 = vmul.f32 0.6931472, %v344_v43  ;;  %v325_v0 = vld [vmem:[#allocation7] ss:$0 sm:$0xff] }
  0xca   :  { %218 = vmatmul.f32.vlgmr.msra.gmra.mxu0 %v180_v41  ;;  %v147_v47 = vmul.f32 0.5, %v145_v44 }
  0xcc   :  { %v177_v38 = vmul.f32 %v175_v48, %v147_v47 }
  0xce   :  { %v179_v49 = vmul.f32 %v508_v50, %v177_v38 }
  0xd0   :  { %v181_v51 = vmul.f32 %v179_v49, %v497_v2 }
  0xd2   :  { %221 = vmatmul.f32.vlgmr.msra.gmra.mxu1 %v181_v51 }
 0x147   :  { %v219_v52 = vpop.f32.mrf.mxu0 }
 0x148   :  { %v220_v53 = vadd.f32 %v325_v0, %v219_v52 }
 0x14a   :  { %225 = vadd.xlane.f32.xlu1 %v220_v53 }
 0x14f   :  { %v222_v54 = vpop.f32.mrf.mxu1 }
 0x150   :  { %v223_v55 = vadd.f32 %v325_v0, %v222_v54 }
 0x152   :  { %227 = vadd.xlane.f32.xlu1 %v223_v55 }
 0x1bd   :  { %v226_v56 = vpop.xlane.xlu1 %225 }
 0x1be   :  { %v229_v57 = vmul.f32 0.03125, %v226_v56 }
 0x1c0   :  { %v231_v59 = vsub.f32 %v220_v53, %v229_v57 }
 0x1c2   :  { %v235_v60 = vmul.f32 %v326_v58, %v231_v59 }
 0x1c4   :  { %v237_v61 = vmul.f32 %v235_v60, %v235_v60 }
 0x1c5   :  { %v228_v62 = vpop.xlane.xlu1 %227 }
 0x1c6   :  { %239 = vadd.xlane.f32.xlu2 %v237_v61  ;;  %v230_v63 = vmul.f32 0.03125, %v228_v62 }
 0x1c8   :  { %v232_v50 = vsub.f32 %v223_v55, %v230_v63 }
 0x1ca   :  { %v236_v1 = vmul.f32 %v326_v58, %v232_v50 }
 0x1cc   :  { %v238_v2 = vmul.f32 %v236_v1, %v236_v1 }
 0x1ce   :  { %241 = vadd.xlane.f32.xlu2 %v238_v2 }
 0x239   :  { %v240_v3 = vpop.xlane.xlu2 %239 }
 0x23a   :  { %v243_v4 = vmul.f32 0.03125, %v240_v3 }
 0x23c   :  { %v245_v5 = vadd.f32 1e-05, %v243_v4 }
 0x23e   :  { %345 = vrsqrt.f32 %v245_v5  ;;  %vm253_vm7 = vweird.f32 %v245_v5 }
 0x241   :  { %v242_v6 = vpop.xlane.xlu2 %241 }
 0x242   :  { %v244_v8 = vmul.f32 0.03125, %v242_v6 }
 0x244   :  { %v346_v7 = vpop.eup %345  ;;  %v246_v10 = vadd.f32 1e-05, %v244_v8 }
 0x245   :  { %v248_v9 = vmul.f32 %v346_v7, %v245_v5  ;;  %vm254_vm6 = vweird.f32 %v346_v7 }
 0x246   :  { %347 = vrsqrt.f32 %v246_v10  ;;  %vm255_vm8 = vmor %vm253_vm7, %vm254_vm6  ;;  %vm263_vm11 = vweird.f32 %v246_v10 }
 0x247   :  { %v249_v11 = vmul.f32 %v346_v7, %v248_v9 }
 0x249   :  { %v250_v12 = vmul.f32 0.5, %v249_v11 }
 0x24b   :  { %v251_v13 = vsub.f32 1.5, %v250_v12 }
 0x24c   :  { %v348_v15 = vpop.eup %347 }
 0x24d   :  { %v252_v14 = vmul.f32 %v346_v7, %v251_v13  ;;  %v258_v18 = vmul.f32 %v348_v15, %v246_v10  ;;  %vm264_vm9 = vweird.f32 %v348_v15 }
 0x24e   :  { %vm265_vm12 = vmor %vm263_vm11, %vm264_vm9 }
 0x24f   :  { %v256_v17 = vsel %vm255_vm8, %v346_v7, %v252_v14  ;;  %v259_v21 = vmul.f32 %v348_v15, %v258_v18 }
 0x250   :  { %v267_v19 = vmul.f32 %v256_v17, %v235_v60 }
 0x251   :  { %v260_v23 = vmul.f32 0.5, %v259_v21 }
 0x252   :  { %v270_v22 = vmul.f32 %v327_v16, %v267_v19 }
 0x253   :  { %v261_v25 = vsub.f32 1.5, %v260_v23 }
 0x254   :  { %v273_v24 = vadd.f32 %v328_v20, %v270_v22 }
 0x255   :  { %v262_v27 = vmul.f32 %v348_v15, %v261_v25 }
 0x256   :  { %v275_v26 = vmax.f32 %v273_v24, 0.0 }
 0x257   :  { %v266_v28 = vsel %vm265_vm12, %v348_v15, %v262_v27 }
 0x258   :  { %278 = vst.msk [vmem:[#allocation8] sm:$0xff] %vm277_vm10, %v275_v26  ;;  %v268_v29 = vmul.f32 %v266_v28, %v236_v1 }
 0x25a   :  { %v271_v30 = vmul.f32 %v327_v16, %v268_v29 }
 0x25c   :  { %v274_v31 = vadd.f32 %v328_v20, %v271_v30 }
 0x25e   :  { %v276_v32 = vmax.f32 %v274_v31, 0.0 }
 0x260   :  { %279 = vst.msk [vmem:[#allocation8 + $0x8] sm:$0xff] %vm277_vm10, %v276_v32 }
 0x261   :  { %292 = dma.vmem_to_hbm [thread:$0]  %s285_s27, 256, %s287_s30, [#allocation4], %s452_s20, %s452_s20, %s453_s21  }
 0x262   :  { %449 = dma.done.wait [#allocation4], 256  }
 0x263   :  { %450 = vsyncadd [#allocation4], 4294967040 }
 0x264   :  { %297 = vsyncpa [#allocation3], 1 }
 0x265   :  { %298 = vsyncpa [#allocation6], 1 }
 0x266   :  { %299 = vsyncpa [#allocation4], 1 }

</bundles_post_ra>
